<compile_context>
chip_gen: v5e
topology: v5e:2x2
jax: 0.10.0
libtpu: 0.0.40
codegen_flags: <defaults>
</compile_context>

<pallas_src>
import functools

import jax
import jax.numpy as jnp
from jax.experimental import pallas as pl
from jax.experimental.pallas import tpu as pltpu

_MiB = 1024 * 1024


def _round_up(x, m):
    return ((x + m - 1) // m) * m


# ---------------------------------------------------------------------------
# Best-effort hardware detection (never fatal).
# ---------------------------------------------------------------------------
def _tpu_vmem_and_cores():
    kind = ""
    try:
        kind = jax.devices()[0].device_kind.lower()
    except Exception:
        pass

    vmem_bytes = None
    num_cores = 1
    try:
        info = pltpu.get_tpu_info()
        for attr in ("vmem_capacity_bytes", "vmem_bytes", "vmem_size_bytes"):
            v = getattr(info, attr, None)
            if isinstance(v, int) and v > 0:
                vmem_bytes = v
                break
        for attr in ("num_cores", "core_count", "num_tensorcores",
                     "tensorcore_count"):
            c = getattr(info, attr, None)
            if isinstance(c, int) and c > 0:
                num_cores = c
                break
    except Exception:
        pass

    if vmem_bytes is None:
        if any(t in kind for t in ("v4", "v5", "v6")):
            vmem_bytes = 128 * _MiB      # v4/v5e/v5p/v6e: 128 MiB VMEM
        else:
            vmem_bytes = 64 * _MiB       # conservative: fits every generation
    if num_cores <= 1 and "v7" in kind:
        num_cores = 2                    # v7x: 2 TensorCores per chip
    return vmem_bytes, num_cores


def _vmem_budget_and_limit(vmem_capacity):
    """Tile-selection budget + scoped VMEM limit, derived from one number."""
    if vmem_capacity <= 64 * _MiB:
        # v7x-class (64 MiB / TensorCore): leave compiler-scratch headroom.
        budget = min(vmem_capacity * 5 // 8, 40 * _MiB)
        limit = min(budget + 8 * _MiB, 48 * _MiB)
    else:
        # 128 MiB parts (v5e / v6e / ...): plenty of headroom.
        budget = 64 * _MiB
        limit = 80 * _MiB
    return budget, limit


# ---------------------------------------------------------------------------
# Kernel
# ---------------------------------------------------------------------------
def _layer_sum_kernel(*refs, num_layers, scale):
    """refs = L input tiles of shape (tile_n, H) + 1 output tile."""
    in_refs = refs[:num_layers]
    o_ref = refs[num_layers]
    acc = in_refs[0][...].astype(jnp.float32)
    for r in in_refs[1:]:
        acc = acc + r[...].astype(jnp.float32)
    if scale != 1.0:                 # 'mean': fold 1/L into the final pass
        acc = acc * scale
    o_ref[...] = acc.astype(o_ref.dtype)


def _choose_tile_n(n_rows, num_layers, hidden, itemsize, budget, num_cores,
                   sublane):
    """Largest row tile (multiple of the dtype-native sublane count) whose
    double-buffered working set fits `budget`."""
    # 2 buffers per input block (L inputs) + 2 buffers for the output block.
    per_row = (2 * num_layers + 2) * hidden * itemsize
    tile = (budget // max(per_row, 1)) // sublane * sublane
    tile = max(tile, sublane)
    if num_cores > 1:
        # >= 2 grid steps per core so both TCs get work and each core still
        # overlaps prefetch/writeback with compute.
        min_steps = 2 * num_cores
        if n_rows > min_steps * sublane:
            tile = min(tile, _round_up(pl.cdiv(n_rows, min_steps), sublane))
    if tile >= n_rows:
        # Single full block; a full-extent dim is always a legal block shape.
        return n_rows
    return tile


def _layer_reduce(flat_layers, *, mean, tile_override=None):
    """flat_layers: list of L arrays [N, H] -> [N, H] sum/mean over L."""
    num_layers = len(flat_layers)
    n_rows, hidden = flat_layers[0].shape
    dtype = flat_layers[0].dtype
    itemsize = jnp.dtype(dtype).itemsize
    # dtype-native sublane multiple: 8 (f32) / 16 (bf16) / 32 (int8, fp8).
    sublane = max(8, 32 // itemsize)

    vmem_capacity, num_cores = _tpu_vmem_and_cores()
    budget, vmem_limit = _vmem_budget_and_limit(vmem_capacity)

    if tile_override is not None:
        tile_n = tile_override
    else:
        tile_n = _choose_tile_n(n_rows, num_layers, hidden, itemsize, budget,
                                num_cores, sublane)

    scale = (1.0 / num_layers) if mean else 1.0
    kernel = functools.partial(_layer_sum_kernel, num_layers=num_layers,
                               scale=scale)
    cost = pl.CostEstimate(
        flops=(num_layers - 1 + (1 if mean else 0)) * n_rows * hidden,
        transcendentals=0,
        bytes_accessed=(num_layers + 1) * n_rows * hidden * itemsize,
    )

    def build(tile, semantics, limit):
        grid = (pl.cdiv(n_rows, tile),)
        block = lambda: pl.BlockSpec((tile, hidden), lambda i: (i, 0))
        return pl.pallas_call(
            kernel,
            out_shape=jax.ShapeDtypeStruct((n_rows, hidden), dtype),
            grid_spec=pltpu.PrefetchScalarGridSpec(
                num_scalar_prefetch=0,
                grid=grid,
                in_specs=[block() for _ in range(num_layers)],
                out_specs=block(),
            ),
            compiler_params=pltpu.CompilerParams(
                dimension_semantics=semantics,
                vmem_limit_bytes=limit,
            ),
            cost_estimate=cost,
        )

    grid_steps = pl.cdiv(n_rows, tile_n)
    if num_cores > 1 and grid_steps >= num_cores:
        # Real multi-TensorCore sharding of the row axis (v7x).
        semantics = (pltpu.CORE_PARALLEL,)
    else:
        semantics = ("parallel",)

    try:
        return build(tile_n, semantics, vmem_limit)(*flat_layers)
    except Exception:
        # Conservative fallback guaranteed to compile on any generation.
        fb_tile = _choose_tile_n(n_rows, num_layers, hidden, itemsize,
                                 12 * _MiB, 1, sublane)
        return build(fb_tile, ("arbitrary",), 32 * _MiB)(*flat_layers)


def _lane_dense_view(n_rows, hidden):
    """Pick a [rows, width] 2-D view with a lane-dense (multiple-of-128) last
    dim when `hidden` itself is not; the reduction is purely elementwise so
    any same-size 2-D view is valid (and the reshape is free)."""
    if hidden % 128 == 0:
        return n_rows, hidden
    total = n_rows * hidden
    for width in (2048, 1024, 512, 256, 128):
        if total % width == 0:
            return total // width, width
    return n_rows, hidden


class ExtraRobertaPallas:
    """JAX/Pallas port of ExtraRoberta."""

    def __init__(self, method="sum", layers=(-1, -2, -3, -4)):
        assert method in ("sum", "concat", "mean")
        self.method = method
        self.layers = list(layers)

    def __call__(self, inputs):
        # inputs: sequence of arrays, each [B, S, H]
        hidden_states = [inputs[i] for i in self.layers]
        if self.method == "concat":
            # Pure data movement; XLA's concatenate is optimal here.
            # TODO(synk): when the consumer is a projection matmul, skip
            # materializing [.., L*H] and read the L inputs directly.
            return jnp.concatenate(hidden_states, axis=-1)
        B, S, H = hidden_states[0].shape
        rows, width = _lane_dense_view(B * S, H)
        flat = [h.reshape(rows, width) for h in hidden_states]  # free views
        out = _layer_reduce(flat, mean=(self.method == "mean"))
        return out.reshape(B, S, H)


def _reference(inputs, method, layers):
    hs = [inputs[i] for i in layers]
    emb = jnp.stack(hs, axis=0)
    if method == "sum":
        return jnp.sum(emb, axis=0)
    if method == "mean":
        return jnp.mean(emb, axis=0)
    return jnp.concatenate(hs, axis=-1)


if __name__ == "__main__":
    key = jax.random.PRNGKey(0)
    B, S, H = 2, 8, 32
    num_hidden = 6  # pretend the encoder produced 6 hidden states
    layers = [-1, -2, -3, -4]

    keys = jax.random.split(key, num_hidden)
    hidden_states = [
        jax.random.normal(k, (B, S, H), dtype=jnp.float32) for k in keys
    ]

    for method in ("sum", "mean", "concat"):
        out = jax.block_until_ready(
            ExtraRobertaPallas(method=method, layers=layers)(hidden_states))
        ref = _reference(hidden_states, method, layers)
        assert out.shape == ref.shape, (method, out.shape, ref.shape)
        assert jnp.allclose(out, ref, atol=1e-5, rtol=1e-5), f"mismatch: {method}"

    # Row count whose flattened size is not a multiple of 128 -> exercises the
    # non-lane-dense fallback view.
    S2 = 9
    keys2 = jax.random.split(jax.random.PRNGKey(1), num_hidden)
    hs2 = [jax.random.normal(k, (B, S2, H), dtype=jnp.float32) for k in keys2]
    out2 = jax.block_until_ready(ExtraRobertaPallas(method="sum")(hs2))
    ref2 = _reference(hs2, "sum", layers)
    assert jnp.allclose(out2, ref2, atol=1e-5, rtol=1e-5), "mismatch: fallback view"

    # Forced small tile -> multi-block grid with a masked tail block (f32).
    keys3 = jax.random.split(jax.random.PRNGKey(2), 4)
    flat3 = [jax.random.normal(k, (44, 256), dtype=jnp.float32) for k in keys3]
    out3 = jax.block_until_ready(
        _layer_reduce(flat3, mean=False, tile_override=8))
    ref3 = sum(flat3[1:], flat3[0])
    assert jnp.allclose(out3, ref3, atol=1e-5, rtol=1e-5), "mismatch: tail block"

    # bf16 path: 16-row sublane-native tile with a masked tail block.
    keys4 = jax.random.split(jax.random.PRNGKey(3), 4)
    flat4 = [jax.random.normal(k, (44, 256), dtype=jnp.bfloat16) for k in keys4]
    out4 = jax.block_until_ready(
        _layer_reduce(flat4, mean=True, tile_override=16))
    ref4 = (sum(x.astype(jnp.float32) for x in flat4) / 4.0).astype(jnp.bfloat16)
    assert jnp.allclose(out4.astype(jnp.float32), ref4.astype(jnp.float32),
                        atol=0.05, rtol=0.05), "mismatch: bf16"

    print("KERNEL_OK")
</pallas_src>

<mosaic_0001>
module attributes {stable_mosaic.version = 11 : i64} {
  func.func @_layer_sum_kernel(%arg0: i32, %arg1: memref<1x512xf32, #tpu.memory_space<vmem>>, %arg2: memref<1x512xf32, #tpu.memory_space<vmem>>, %arg3: memref<1x512xf32, #tpu.memory_space<vmem>>, %arg4: memref<1x512xf32, #tpu.memory_space<vmem>>, %arg5: memref<1x512xf32, #tpu.memory_space<vmem>>) attributes {dimension_semantics = [#tpu.dimension_semantics<parallel>], iteration_bounds = array<i64: 1>, scalar_prefetch = 0 : i64, scratch_operands = 0 : i64, tpu.core_type = #tpu.core_type<tc>, window_params = [{transform_indices = @transform_0, window_bounds = array<i64: 1, 512>}, {transform_indices = @transform_1, window_bounds = array<i64: 1, 512>}, {transform_indices = @transform_2, window_bounds = array<i64: 1, 512>}, {transform_indices = @transform_3, window_bounds = array<i64: 1, 512>}, {transform_indices = @transform_4, window_bounds = array<i64: 1, 512>}]} {
    %c0 = arith.constant 0 : index
    %c0_0 = arith.constant 0 : index
    %0 = vector.load %arg1[%c0, %c0_0] : memref<1x512xf32, #tpu.memory_space<vmem>>, vector<1x512xf32>
    %c0_1 = arith.constant 0 : index
    %c0_2 = arith.constant 0 : index
    %1 = vector.load %arg2[%c0_1, %c0_2] : memref<1x512xf32, #tpu.memory_space<vmem>>, vector<1x512xf32>
    %2 = arith.addf %0, %1 : vector<1x512xf32>
    %c0_3 = arith.constant 0 : index
    %c0_4 = arith.constant 0 : index
    %3 = vector.load %arg3[%c0_3, %c0_4] : memref<1x512xf32, #tpu.memory_space<vmem>>, vector<1x512xf32>
    %4 = arith.addf %2, %3 : vector<1x512xf32>
    %c0_5 = arith.constant 0 : index
    %c0_6 = arith.constant 0 : index
    %5 = vector.load %arg4[%c0_5, %c0_6] : memref<1x512xf32, #tpu.memory_space<vmem>>, vector<1x512xf32>
    %6 = arith.addf %4, %5 : vector<1x512xf32>
    %c0_7 = arith.constant 0 : index
    %c0_8 = arith.constant 0 : index
    %7 = vector.load %arg5[%c0_7, %c0_8] : memref<1x512xf32, #tpu.memory_space<vmem>>, vector<1x512xf32>
    tpu.vector_store %arg5[%c0_7, %c0_8], %6 {strides = array<i32>} : memref<1x512xf32, #tpu.memory_space<vmem>>, vector<1x512xf32>,
    return
  }
  func.func @transform_0(%arg0: i32) -> (i32, i32) {
    %c0_i32 = arith.constant 0 : i32
    %c0_i32_0 = arith.constant 0 : i32
    return %arg0, %c0_i32 : i32, i32
  }
  func.func @transform_1(%arg0: i32) -> (i32, i32) {
    %c0_i32 = arith.constant 0 : i32
    %c0_i32_0 = arith.constant 0 : i32
    return %arg0, %c0_i32 : i32, i32
  }
  func.func @transform_2(%arg0: i32) -> (i32, i32) {
    %c0_i32 = arith.constant 0 : i32
    %c0_i32_0 = arith.constant 0 : i32
    return %arg0, %c0_i32 : i32, i32
  }
  func.func @transform_3(%arg0: i32) -> (i32, i32) {
    %c0_i32 = arith.constant 0 : i32
    %c0_i32_0 = arith.constant 0 : i32
    return %arg0, %c0_i32 : i32, i32
  }
  func.func @transform_4(%arg0: i32) -> (i32, i32) {
    %c0_i32 = arith.constant 0 : i32
    %c0_i32_0 = arith.constant 0 : i32
    return %arg0, %c0_i32 : i32, i32
  }
}

module attributes {stable_mosaic.version = 11 : i64} {
  func.func @_layer_sum_kernel(%arg0: i32, %arg1: memref<1x512xf32, #tpu.memory_space<vmem>>, %arg2: memref<1x512xf32, #tpu.memory_space<vmem>>, %arg3: memref<1x512xf32, #tpu.memory_space<vmem>>, %arg4: memref<1x512xf32, #tpu.memory_space<vmem>>, %arg5: memref<1x512xf32, #tpu.memory_space<vmem>>) attributes {dimension_semantics = [#tpu.dimension_semantics<arbitrary>], iteration_bounds = array<i64: 1>, scalar_prefetch = 0 : i64, scratch_operands = 0 : i64, tpu.core_type = #tpu.core_type<tc>, window_params = [{transform_indices = @transform_0, window_bounds = array<i64: 1, 512>}, {transform_indices = @transform_1, window_bounds = array<i64: 1, 512>}, {transform_indices = @transform_2, window_bounds = array<i64: 1, 512>}, {transform_indices = @transform_3, window_bounds = array<i64: 1, 512>}, {transform_indices = @transform_4, window_bounds = array<i64: 1, 512>}]} {
    %c0 = arith.constant 0 : index
    %c0_0 = arith.constant 0 : index
    %0 = vector.load %arg1[%c0, %c0_0] : memref<1x512xf32, #tpu.memory_space<vmem>>, vector<1x512xf32>
    %c0_1 = arith.constant 0 : index
    %c0_2 = arith.constant 0 : index
    %1 = vector.load %arg2[%c0_1, %c0_2] : memref<1x512xf32, #tpu.memory_space<vmem>>, vector<1x512xf32>
    %2 = arith.addf %0, %1 : vector<1x512xf32>
    %c0_3 = arith.constant 0 : index
    %c0_4 = arith.constant 0 : index
    %3 = vector.load %arg3[%c0_3, %c0_4] : memref<1x512xf32, #tpu.memory_space<vmem>>, vector<1x512xf32>
    %4 = arith.addf %2, %3 : vector<1x512xf32>
    %c0_5 = arith.constant 0 : index
    %c0_6 = arith.constant 0 : index
    %5 = vector.load %arg4[%c0_5, %c0_6] : memref<1x512xf32, #tpu.memory_space<vmem>>, vector<1x512xf32>
    %6 = arith.addf %4, %5 : vector<1x512xf32>
    %c0_7 = arith.constant 0 : index
    %c0_8 = arith.constant 0 : index
    %7 = vector.load %arg5[%c0_7, %c0_8] : memref<1x512xf32, #tpu.memory_space<vmem>>, vector<1x512xf32>
    tpu.vector_store %arg5[%c0_7, %c0_8], %6 {strides = array<i32>} : memref<1x512xf32, #tpu.memory_space<vmem>>, vector<1x512xf32>,
    return
  }
  func.func @transform_0(%arg0: i32) -> (i32, i32) {
    %c0_i32 = arith.constant 0 : i32
    %c0_i32_0 = arith.constant 0 : i32
    return %arg0, %c0_i32 : i32, i32
  }
  func.func @transform_1(%arg0: i32) -> (i32, i32) {
    %c0_i32 = arith.constant 0 : i32
    %c0_i32_0 = arith.constant 0 : i32
    return %arg0, %c0_i32 : i32, i32
  }
  func.func @transform_2(%arg0: i32) -> (i32, i32) {
    %c0_i32 = arith.constant 0 : i32
    %c0_i32_0 = arith.constant 0 : i32
    return %arg0, %c0_i32 : i32, i32
  }
  func.func @transform_3(%arg0: i32) -> (i32, i32) {
    %c0_i32 = arith.constant 0 : i32
    %c0_i32_0 = arith.constant 0 : i32
    return %arg0, %c0_i32 : i32, i32
  }
  func.func @transform_4(%arg0: i32) -> (i32, i32) {
    %c0_i32 = arith.constant 0 : i32
    %c0_i32_0 = arith.constant 0 : i32
    return %arg0, %c0_i32 : i32, i32
  }
}

</mosaic_0001>

<bundles_post_ra>
// kernel: tpu_custom_call.1
= control target key start
LH: loop header
LB: loop body
LE: loop exit
PB: predicated region body
PF: predicated region fallthrough
CT: control target
= control target key end

     0   :  { %9 = vsyncpa [#allocation3], 0  ;;  %s282_s0 = inlined_call_operand.hbm [shape: f32[1,512], index: 0, kind: input, shape index: {}]   ;;  %s283_s1 = inlined_call_operand.hbm [shape: f32[1,512], index: 1, kind: input, shape index: {}]   ;;  %s284_s2 = inlined_call_operand.hbm [shape: f32[1,512], index: 2, kind: input, shape index: {}]   ;;  %s285_s3 = inlined_call_operand.hbm [shape: f32[1,512], index: 3, kind: input, shape index: {}]   ;;  %s286_s4 = inlined_call_operand.hbm [shape: f32[1,512], index: 4, kind: output, shape index: {}]  }
   0x1   :  { %10 = vsyncpa [#allocation6], 0 }
   0x2   :  { %11 = vsyncpa [#allocation9], 0  ;;  %s29_s17 = sshll.u32 %s283_s1, 4  ;;  %s30_s17 = int_to_ptr.hbm [resolvable:$true] %s29_s17 }
   0x3   :  { %12 = vsyncpa [#allocation4], 0  ;;  %s237_s18 = smov [#allocation5]   ;;  %s18_s22 = sshll.u32 %s282_s0, 4  ;;  %s19_s22 = int_to_ptr.hbm [resolvable:$true] %s18_s22 }
   0x4   :  { %s31_s19 = sshll.u32 %s237_s18, 4  ;;  %s238_s23 = smov [#allocation2]   ;;  %s32_s19 = int_to_ptr.vmem [resolvable:$true] %s31_s19 }
   0x5   :  { %34 = dma.hbm_to_vmem [thread:$0]  %s30_s17, 64, %s32_s19, [#allocation6]  }
   0x6   :  { %s20_s24 = sshll.u32 %s238_s23, 4  ;;  %s40_s27 = sshll.u32 %s284_s2, 4  ;;  %s21_s24 = int_to_ptr.vmem [resolvable:$true] %s20_s24  ;;  %s41_s27 = int_to_ptr.hbm [resolvable:$true] %s40_s27 }
   0x7   :  { %23 = dma.hbm_to_vmem [thread:$0]  %s19_s22, 64, %s21_s24, [#allocation3]  }
   0x8   :  { %s51_s29 = sshll.u32 %s285_s3, 4  ;;  %s239_s30 = smov [#allocation7]   ;;  %s52_s29 = int_to_ptr.hbm [resolvable:$true] %s51_s29 }
   0x9   :  { %s42_s5 = sshll.u32 %s239_s30, 4  ;;  %s240_s0 = smov [#allocation8]   ;;  %s43_s5 = int_to_ptr.vmem [resolvable:$true] %s42_s5 }
   0xa   :  { %45 = dma.hbm_to_vmem [thread:$0]  %s41_s27, 64, %s43_s5, [#allocation6]  }
   0xb   :  { %s53_s6 = sshll.u32 %s240_s0, 4  ;;  %s54_s6 = int_to_ptr.vmem [resolvable:$true] %s53_s6 }
   0xc   :  { %56 = dma.hbm_to_vmem [thread:$0]  %s52_s29, 64, %s54_s6, [#allocation9]  }
   0xd   :  { %229 = dma.done.wait [#allocation3], 64  }
   0xe   :  { %230 = vsyncadd [#allocation3], 4294967232 }
   0xf   :  { %231 = dma.done.wait [#allocation6], 128  }
  0x10   :  { %232 = vsyncadd [#allocation6], 4294967168 }
  0x11   :  { %233 = dma.done.wait [#allocation9], 64  }
  0x12   :  { %234 = vsyncadd [#allocation9], 4294967232  ;;  %v73_v0 = vld [vmem:[#allocation2] sm:$0xf]  ;;  %v74_v1 = vld [vmem:[#allocation5] sm:$0xf]  ;;  %v80_v3 = vlaneseq }
  0x13   :  { %v76_v2 = vld [vmem:[#allocation7] sm:$0xf]  ;;  %v75_v4 = vadd.f32 %v74_v1, %v73_v0  ;;  %v78_v5 = vld [vmem:[#allocation8] sm:$0xf]  ;;  %s241_s2 = smov [#allocation10]   ;;  %s92_s9 = sshll.u32 %s286_s4, 4  ;;  %s93_s9 = int_to_ptr.hbm [resolvable:$true] %s92_s9 }
  0x14   :  { %s90_s3 = sshll.u32 %s241_s2, 4  ;;  %vm82_vm0 = vcmp.lt.s32.totalorder %v80_v3, 512  ;;  %s91_s3 = int_to_ptr.vmem [resolvable:$true] %s90_s3 }
  0x15   :  { %v77_v6 = vadd.f32 %v76_v2, %v75_v4 }
  0x17   :  { %v79_v7 = vadd.f32 %v78_v5, %v77_v6 }
  0x19   :  { %84 = vst.msk [vmem:[#allocation10] sm:$0xf] %vm82_vm0, %v79_v7 }
  0x1a   :  { %95 = dma.vmem_to_hbm [thread:$0]  %s91_s3, 64, %s93_s9, [#allocation4]  }
  0x1b   :  { %235 = dma.done.wait [#allocation4], 64  }
  0x1c   :  { %236 = vsyncadd [#allocation4], 4294967232 }
  0x1d   :  { %100 = vsyncpa [#allocation3], 1 }
  0x1e   :  { %101 = vsyncpa [#allocation6], 1 }
  0x1f   :  { %102 = vsyncpa [#allocation9], 1 }
  0x20   :  { %103 = vsyncpa [#allocation4], 1 }

// kernel: tpu_custom_call.1
= control target key start
LH: loop header
LB: loop body
LE: loop exit
PB: predicated region body
PF: predicated region fallthrough
CT: control target
= control target key end

     0   :  { %9 = vsyncpa [#allocation3], 0  ;;  %s282_s0 = inlined_call_operand.hbm [shape: f32[1,512], index: 0, kind: input, shape index: {}]   ;;  %s283_s1 = inlined_call_operand.hbm [shape: f32[1,512], index: 1, kind: input, shape index: {}]   ;;  %s284_s2 = inlined_call_operand.hbm [shape: f32[1,512], index: 2, kind: input, shape index: {}]   ;;  %s285_s3 = inlined_call_operand.hbm [shape: f32[1,512], index: 3, kind: input, shape index: {}]   ;;  %s286_s4 = inlined_call_operand.hbm [shape: f32[1,512], index: 4, kind: output, shape index: {}]  }
   0x1   :  { %10 = vsyncpa [#allocation6], 0 }
   0x2   :  { %11 = vsyncpa [#allocation9], 0  ;;  %s29_s17 = sshll.u32 %s283_s1, 4  ;;  %s30_s17 = int_to_ptr.hbm [resolvable:$true] %s29_s17 }
   0x3   :  { %12 = vsyncpa [#allocation4], 0  ;;  %s237_s18 = smov [#allocation5]   ;;  %s18_s22 = sshll.u32 %s282_s0, 4  ;;  %s19_s22 = int_to_ptr.hbm [resolvable:$true] %s18_s22 }
   0x4   :  { %s31_s19 = sshll.u32 %s237_s18, 4  ;;  %s238_s23 = smov [#allocation2]   ;;  %s32_s19 = int_to_ptr.vmem [resolvable:$true] %s31_s19 }
   0x5   :  { %34 = dma.hbm_to_vmem [thread:$0]  %s30_s17, 64, %s32_s19, [#allocation6]  }
   0x6   :  { %s20_s24 = sshll.u32 %s238_s23, 4  ;;  %s40_s27 = sshll.u32 %s284_s2, 4  ;;  %s21_s24 = int_to_ptr.vmem [resolvable:$true] %s20_s24  ;;  %s41_s27 = int_to_ptr.hbm [resolvable:$true] %s40_s27 }
   0x7   :  { %23 = dma.hbm_to_vmem [thread:$0]  %s19_s22, 64, %s21_s24, [#allocation3]  }
   0x8   :  { %s51_s29 = sshll.u32 %s285_s3, 4  ;;  %s239_s30 = smov [#allocation7]   ;;  %s52_s29 = int_to_ptr.hbm [resolvable:$true] %s51_s29 }
   0x9   :  { %s42_s5 = sshll.u32 %s239_s30, 4  ;;  %s240_s0 = smov [#allocation8]   ;;  %s43_s5 = int_to_ptr.vmem [resolvable:$true] %s42_s5 }
   0xa   :  { %45 = dma.hbm_to_vmem [thread:$0]  %s41_s27, 64, %s43_s5, [#allocation6]  }
   0xb   :  { %s53_s6 = sshll.u32 %s240_s0, 4  ;;  %s54_s6 = int_to_ptr.vmem [resolvable:$true] %s53_s6 }
   0xc   :  { %56 = dma.hbm_to_vmem [thread:$0]  %s52_s29, 64, %s54_s6, [#allocation9]  }
   0xd   :  { %229 = dma.done.wait [#allocation3], 64  }
   0xe   :  { %230 = vsyncadd [#allocation3], 4294967232 }
   0xf   :  { %231 = dma.done.wait [#allocation6], 128  }
  0x10   :  { %232 = vsyncadd [#allocation6], 4294967168 }
  0x11   :  { %233 = dma.done.wait [#allocation9], 64  }
  0x12   :  { %234 = vsyncadd [#allocation9], 4294967232  ;;  %v73_v0 = vld [vmem:[#allocation2] sm:$0xf]  ;;  %v74_v1 = vld [vmem:[#allocation5] sm:$0xf]  ;;  %v80_v3 = vlaneseq }
  0x13   :  { %v76_v2 = vld [vmem:[#allocation7] sm:$0xf]  ;;  %v75_v4 = vadd.f32 %v74_v1, %v73_v0  ;;  %v78_v5 = vld [vmem:[#allocation8] sm:$0xf]  ;;  %s241_s2 = smov [#allocation10]   ;;  %s92_s9 = sshll.u32 %s286_s4, 4  ;;  %s93_s9 = int_to_ptr.hbm [resolvable:$true] %s92_s9 }
  0x14   :  { %s90_s3 = sshll.u32 %s241_s2, 4  ;;  %vm82_vm0 = vcmp.lt.s32.totalorder %v80_v3, 512  ;;  %s91_s3 = int_to_ptr.vmem [resolvable:$true] %s90_s3 }
  0x15   :  { %v77_v6 = vadd.f32 %v76_v2, %v75_v4 }
  0x17   :  { %v79_v7 = vadd.f32 %v78_v5, %v77_v6 }
  0x19   :  { %84 = vst.msk [vmem:[#allocation10] sm:$0xf] %vm82_vm0, %v79_v7 }
  0x1a   :  { %95 = dma.vmem_to_hbm [thread:$0]  %s91_s3, 64, %s93_s9, [#allocation4]  }
  0x1b   :  { %235 = dma.done.wait [#allocation4], 64  }
  0x1c   :  { %236 = vsyncadd [#allocation4], 4294967232 }
  0x1d   :  { %100 = vsyncpa [#allocation3], 1 }
  0x1e   :  { %101 = vsyncpa [#allocation6], 1 }
  0x1f   :  { %102 = vsyncpa [#allocation9], 1 }
  0x20   :  { %103 = vsyncpa [#allocation4], 1 }

</bundles_post_ra>
